<compile_context>
chip_gen: v7x
topology: tpu7x:2x2x1
jax: 0.10.0
libtpu: 0.0.40
codegen_flags: <defaults>
</compile_context>

<pallas_src>
import functools

import jax
import jax.numpy as jnp
from jax.experimental import pallas as pl
from jax.experimental.pallas import tpu as pltpu


def _encoder_text_global_kernel(cap_ref, w2_ref, b_ref, out_ref, *, no_txtnorm):
    # cap_ref : (TB, LEp)  lane-dense caption tile (row b = flattened (L, E))
    # w2_ref  : (LEp, Gp)  fused weight  W2[l*E+e, g] = fc1_w[l] * fc_w[g, e]
    # b_ref   : (1, Gp)    fused bias = sum(fc1_w) * fc_b + fc1_b (zero-padded)
    # out_ref : (TB, Gp)
    y = jnp.dot(cap_ref[...], w2_ref[...], preferred_element_type=jnp.float32)
    y = y + b_ref[...]                                       # (TB, Gp) fp32
    if not no_txtnorm:
        # l2norm over the feature dim; padded columns are exact zeros so the
        # reduction matches the reference.  Keep sqrt(...) + 1e-8 semantics
        # for bit-level parity with the PyTorch l2norm.
        norm = jnp.sqrt(jnp.sum(y * y, axis=-1, keepdims=True)) + 1e-8
        y = y / norm
    out_ref[...] = y.astype(out_ref.dtype)


def _round_up(x, m):
    return (x + m - 1) // m * m


def _choose_batch_tile(B, LEp, Gp, in_itemsize, budget_bytes=12 * 1024 * 1024):
    """Largest batch tile whose double-buffered, layout-padded in/out tiles fit.

    Models the *padded* per-row footprint (lane-dense rows, fp32 output),
    caps the tile at 512 so v7x's two TensorCores see multiple grid steps,
    and floors at 8 (sublane granularity).
    """
    per_row = 2 * (LEp * in_itemsize + Gp * 4)   # double-buffered input + output
    tb = budget_bytes // max(per_row, 1)
    tb = max(8, min(512, (tb // 8) * 8))
    tb = min(tb, _round_up(B, 8))                # don't over-tile tiny batches
    return tb


def encoder_text_global(captions, cap_lens, fc_w, fc_b, fc1_w, fc1_b,
                        no_txtnorm=False, batch_tile=None,
                        compute_dtype=jnp.float32):
    """captions: (B, L=11, E) float32. cap_lens unused (matches reference)."""
    del cap_lens                       # not used in the reference forward pass
    B, L, E = captions.shape
    G = fc_w.shape[0]
    assert fc_w.shape == (G, E)
    assert fc1_w.shape == (1, L)

    LE = L * E
    LEp = _round_up(LE, 128)           # lane-dense contraction dim (352 -> 384)
    Gp = _round_up(G, 128)             # lane-dense output dim

    # ---- wrapper-side (parameter-sized) preprocessing -----------------------
    # Fold fc1 into fc:  y[b,g] = sum_{l,e} w1[l]*W[g,e]*cap[b,l,e]
    #                             + sum(w1)*fc_b[g] + fc1_b.
    w1 = fc1_w[0]                                                  # (L,)
    w2 = (w1[:, None, None] * jnp.transpose(fc_w)[None, :, :]).reshape(LE, G)
    fused_bias = jnp.sum(w1) * fc_b + fc1_b[0]                     # (G,)
    if LEp != LE or Gp != G:
        w2 = jnp.zeros((LEp, Gp), w2.dtype).at[:LE, :G].set(w2)
    if Gp != G:
        fused_bias = jnp.zeros((Gp,), fused_bias.dtype).at[:G].set(fused_bias)
    fused_bias = fused_bias.reshape(1, Gp).astype(jnp.float32)

    # Lane-dense 2-D caption slab: (B, L*E) zero-padded to (B, LEp).
    cap2d = captions.reshape(B, LE)
    if LEp != LE:
        cap2d = jnp.pad(cap2d, ((0, 0), (0, LEp - LE)))
    cap2d = cap2d.astype(compute_dtype)
    w2 = w2.astype(compute_dtype)
    in_itemsize = jnp.dtype(compute_dtype).itemsize

    # ---- batch tiling (ragged last block; no batch-pad copy) ----------------
    if batch_tile is None:
        TB = _choose_batch_tile(B, LEp, Gp, in_itemsize)
    else:
        TB = int(batch_tile)
        assert TB % 8 == 0, "batch_tile must be a multiple of 8"
    grid = (pl.cdiv(B, TB),)

    # Accurate (padded) VMEM footprint -> explicit scoped-VMEM limit.
    footprint = (2 * TB * LEp * in_itemsize        # caption tiles (double-buf)
                 + 2 * TB * Gp * 4                 # output tiles (double-buf)
                 + 2 * LEp * Gp * in_itemsize      # fused weight (2 buffers)
                 + 2 * 8 * Gp * 4)                 # bias (sublane-padded)
    vmem_limit = int(min(max(2 * footprint + (4 << 20), 16 << 20), 48 << 20))

    kernel = functools.partial(_encoder_text_global_kernel,
                               no_txtnorm=no_txtnorm)

    out = pl.pallas_call(
        kernel,
        out_shape=jax.ShapeDtypeStruct((B, Gp), jnp.float32),
        grid=grid,
        in_specs=[
            pl.BlockSpec((TB, LEp), lambda i: (i, 0)),   # caption stream
            pl.BlockSpec((LEp, Gp), lambda i: (0, 0)),   # fused weight
            pl.BlockSpec((1, Gp), lambda i: (0, 0)),     # fused bias
        ],
        out_specs=pl.BlockSpec((TB, Gp), lambda i: (i, 0)),
        compiler_params=pltpu.CompilerParams(
            dimension_semantics=("parallel",),
            vmem_limit_bytes=vmem_limit),
    )(cap2d, w2, fused_bias)

    return out[:, :G]


def _reference(captions, fc_w, fc_b, fc1_w, fc1_b, no_txtnorm=False):
    """Plain-JAX reference mirroring the PyTorch forward exactly."""
    feat = jnp.einsum("ble,ge->blg", captions, fc_w) + fc_b        # (B, L, G)
    feat = jnp.transpose(feat, (0, 2, 1))                          # (B, G, L)
    feat = jnp.einsum("bgl,ol->bgo", feat, fc1_w) + fc1_b          # (B, G, 1)
    feat = jnp.transpose(feat, (0, 2, 1))[:, 0, :]                 # (B, G)
    if no_txtnorm:
        return feat
    norm = jnp.sqrt(jnp.sum(feat ** 2, axis=-1, keepdims=True)) + 1e-8
    return feat / norm


if __name__ == "__main__":
    key = jax.random.PRNGKey(0)
    L = 11                      # fixed by fc1 = nn.Linear(11, 1)
    E, G = 32, 32

    k_cap, k_w, k_b, k_w1, k_b1, k_cap2 = jax.random.split(key, 6)

    # Torch-Linear-like uniform init.
    fc_w = jax.random.uniform(k_w, (G, E), jnp.float32, -1.0, 1.0) / jnp.sqrt(E)
    fc_b = jax.random.uniform(k_b, (G,), jnp.float32, -1.0, 1.0) / jnp.sqrt(E)
    fc1_w = jax.random.uniform(k_w1, (1, L), jnp.float32, -1.0, 1.0) / jnp.sqrt(L)
    fc1_b = jax.random.uniform(k_b1, (1,), jnp.float32, -1.0, 1.0) / jnp.sqrt(L)

    # Check 1: tiny batch, single (ragged) block, fp32 — 1e-5 parity.
    B = 2
    captions = jax.random.normal(k_cap, (B, L, E), dtype=jnp.float32)
    cap_lens = jnp.full((B,), L, dtype=jnp.int32)
    out = encoder_text_global(captions, cap_lens, fc_w, fc_b, fc1_w, fc1_b)
    out = jax.block_until_ready(out)
    ref = _reference(captions, fc_w, fc_b, fc1_w, fc1_b)
    assert out.shape == (B, G)
    assert jnp.allclose(out, ref, atol=1e-5, rtol=1e-5)

    # Check 2: multi-step batch grid with a ragged last block (no pad copy).
    B2 = 20
    captions2 = jax.random.normal(k_cap2, (B2, L, E), dtype=jnp.float32)
    cap_lens2 = jnp.full((B2,), L, dtype=jnp.int32)
    out2 = encoder_text_global(captions2, cap_lens2, fc_w, fc_b, fc1_w, fc1_b,
                               batch_tile=16)
    out2 = jax.block_until_ready(out2)
    ref2 = _reference(captions2, fc_w, fc_b, fc1_w, fc1_b)
    assert out2.shape == (B2, G)
    assert jnp.allclose(out2, ref2, atol=1e-5, rtol=1e-5)

    # Check 3: bf16 caption/weight stream (fp32 MXU accumulation), looser tol.
    out3 = encoder_text_global(captions2, cap_lens2, fc_w, fc_b, fc1_w, fc1_b,
                               batch_tile=16, compute_dtype=jnp.bfloat16)
    out3 = jax.block_until_ready(out3)
    assert out3.shape == (B2, G)
    assert jnp.allclose(out3, ref2, atol=5e-2, rtol=5e-2)

    print("KERNEL_OK")
</pallas_src>

<mosaic_0001>
module attributes {stable_mosaic.version = 11 : i64} {
  func.func @_encoder_text_global_kernel(%arg0: i32, %arg1: memref<8x384xf32, #tpu.memory_space<vmem>>, %arg2: memref<384x128xf32, #tpu.memory_space<vmem>>, %arg3: memref<1x128xf32, #tpu.memory_space<vmem>>, %arg4: memref<8x128xf32, #tpu.memory_space<vmem>>) attributes {dimension_semantics = [#tpu.dimension_semantics<parallel>], iteration_bounds = array<i64: 1>, scalar_prefetch = 0 : i64, scratch_operands = 0 : i64, tpu.core_type = #tpu.core_type<tc>, window_params = [{transform_indices = @transform_0, window_bounds = array<i64: 8, 384>}, {pipeline_mode = #tpu.pipeline_mode<synchronous>, transform_indices = @transform_1, window_bounds = array<i64: 384, 128>}, {pipeline_mode = #tpu.pipeline_mode<synchronous>, transform_indices = @transform_2, window_bounds = array<i64: 1, 128>}, {transform_indices = @transform_3, window_bounds = array<i64: 8, 128>}]} {
    %c0 = arith.constant 0 : index
    %c0_0 = arith.constant 0 : index
    %0 = vector.load %arg1[%c0, %c0_0] : memref<8x384xf32, #tpu.memory_space<vmem>>, vector<8x384xf32>
    %c0_1 = arith.constant 0 : index
    %c0_2 = arith.constant 0 : index
    %1 = vector.load %arg2[%c0_1, %c0_2] : memref<384x128xf32, #tpu.memory_space<vmem>>, vector<384x128xf32>
    %cst = arith.constant dense<0.000000e+00> : vector<8x128xf32>
    %2 = tpu.matmul %0, %1, %cst {dimension_numbers = #tpu.dot_dimension_numbers<[1], [0], [0], [1], [0, 0, 1, 1], [], []>} : vector<8x384xf32>, vector<384x128xf32>, vector<8x128xf32> -> vector<8x128xf32>
    %c0_3 = arith.constant 0 : index
    %c0_4 = arith.constant 0 : index
    %3 = vector.load %arg3[%c0_3, %c0_4] : memref<1x128xf32, #tpu.memory_space<vmem>>, vector<1x128xf32>
    %4 = vector.broadcast %3 : vector<1x128xf32> to vector<8x128xf32>
    %5 = arith.addf %2, %4 : vector<8x128xf32>
    %6 = arith.mulf %5, %5 : vector<8x128xf32>
    %cst_5 = arith.constant dense<0.000000e+00> : vector<8xf32>
    %7 = vector.multi_reduction <add>, %6, %cst_5 [1] : vector<8x128xf32> to vector<8xf32>
    %8 = vector.shape_cast %7 : vector<8xf32> to vector<8x1xf32>
    %9 = math.sqrt %8 : vector<8x1xf32>
    %cst_6 = arith.constant 9.99999993E-9 : f32
    %10 = vector.broadcast %cst_6 : f32 to vector<8x1xf32>
    %11 = arith.addf %9, %10 : vector<8x1xf32>
    %12 = vector.broadcast %11 : vector<8x1xf32> to vector<8x128xf32>
    %13 = arith.divf %5, %12 : vector<8x128xf32>
    %c0_7 = arith.constant 0 : index
    %c0_8 = arith.constant 0 : index
    %14 = vector.load %arg4[%c0_7, %c0_8] : memref<8x128xf32, #tpu.memory_space<vmem>>, vector<8x128xf32>
    tpu.vector_store %arg4[%c0_7, %c0_8], %13 {strides = array<i32>} : memref<8x128xf32, #tpu.memory_space<vmem>>, vector<8x128xf32>,
    return
  }
  func.func @transform_0(%arg0: i32) -> (i32, i32) {
    %c0_i32 = arith.constant 0 : i32
    %c0_i32_0 = arith.constant 0 : i32
    return %arg0, %c0_i32 : i32, i32
  }
  func.func @transform_1(%arg0: i32) -> (i32, i32) {
    %c0_i32 = arith.constant 0 : i32
    %c0_i32_0 = arith.constant 0 : i32
    %c0_i32_1 = arith.constant 0 : i32
    return %c0_i32, %c0_i32_0 : i32, i32
  }
  func.func @transform_2(%arg0: i32) -> (i32, i32) {
    %c0_i32 = arith.constant 0 : i32
    %c0_i32_0 = arith.constant 0 : i32
    %c0_i32_1 = arith.constant 0 : i32
    return %c0_i32, %c0_i32_0 : i32, i32
  }
  func.func @transform_3(%arg0: i32) -> (i32, i32) {
    %c0_i32 = arith.constant 0 : i32
    %c0_i32_0 = arith.constant 0 : i32
    return %arg0, %c0_i32 : i32, i32
  }
}

</mosaic_0001>

<bundles_post_ra>
// kernel: tpu_custom_call.1
= control target key start
LH: loop header
LB: loop body
LE: loop exit
PB: predicated region body
PF: predicated region fallthrough
CT: control target
= control target key end

     0   :  { %8 = vsyncpa [#allocation3], 0  ;;  %s635_s0 = inlined_call_operand.hbm [shape: f32[2,384], index: 0, kind: input, shape index: {}]   ;;  %s636_s1 = inlined_call_operand.hbm [shape: f32[384,128], index: 1, kind: input, shape index: {}]   ;;  %s637_s2 = inlined_call_operand.vmem [shape: f32[1,128], index: 2, kind: input, shape index: {}]   ;;  %s638_s3 = inlined_call_operand.hbm [shape: f32[2,128], index: 3, kind: output, shape index: {}]  }
   0x1   :  { %9 = vsyncpa [#allocation6], 0 }
   0x2   :  { %10 = vsyncpa [#allocation4], 0 }
   0x3   :  { %15 = vsyncadd [#allocation3], 288  ;;  %s555_s12 = smov [#allocation2]   ;;  %s483_s16 = scalar_lea.hbm %s635_s0, 96 }
   0x4   :  { %s16_s13 = sshll.u32 %s555_s12, 4  ;;  %p484_p0 = scmp.ne.s32.totalorder %s635_s0, %s483_s16  ;;  %s17_s13 = int_to_ptr.vmem [resolvable:$true] %s16_s13 }
   0x5   :  { %p487_p1 = scmp.lt.u32.totalorder %s483_s16, %s635_s0 }
   0x7   :  { %p489_p2 = pnand %p487_p1, %p484_p0 }
   0x9   :  { %492 = shalt.err (!%p489_p2)
}
   0xa   :  { %s493_s21 = scalar_lea.vmem %s17_s13, 96  ;;  %s497_s22 = scalar_lea.vmem %s17_s13, 384 }
   0xb   :  { %p494_p3 = scmp.ne.s32.totalorder %s17_s13, %s493_s21  ;;  %p498_p4 = scmp.lt.s32.totalorder %s17_s13, %s17_s13 }
   0xc   :  { %p499_p5 = scmp.lt.s32.totalorder %s497_s22, %s493_s21 }
   0xe   :  { %p500_p6 = por %p499_p5, %p498_p4 }
  0x10   :  { %p501_p7 = pnand %p500_p6, %p494_p3 }
  0x12   :  { %504 = shalt.err (!%p501_p7)
}
  0x13   :  { %s556_s23 = smov 96   ;;  %s557_s24 = smov 6  }
  0x14   :  { %22 = dma.hbm_to_vmem [thread:$0]  %s635_s0, 96, %s17_s13, [#allocation3], %s556_s23, %s556_s23, %s557_s24  }
  0x15   :  { %s558_s27 = smov [#allocation5]   ;;  %s505_s4 = scalar_lea.hbm %s636_s1, 6144 }
  0x16   :  { %s28_s28 = sshll.u32 %s558_s27, 4  ;;  %p506_p8 = scmp.ne.s32.totalorder %s636_s1, %s505_s4  ;;  %s29_s28 = int_to_ptr.vmem [resolvable:$true] %s28_s28 }
  0x17   :  { %p509_p9 = scmp.lt.u32.totalorder %s505_s4, %s636_s1 }
  0x19   :  { %p511_p10 = pnand %p509_p9, %p506_p8 }
  0x1b   :  { %514 = shalt.err (!%p511_p10)
}
  0x1c   :  { %s515_s9 = scalar_lea.vmem %s29_s28, 6144  ;;  %p520_p12 = scmp.lt.s32.totalorder %s29_s28, %s29_s28 }
  0x1d   :  { %p516_p11 = scmp.ne.s32.totalorder %s29_s28, %s515_s9  ;;  %p521_p13 = scmp.lt.s32.totalorder %s515_s9, %s515_s9 }
  0x1f   :  { %p522_p0 = por %p521_p13, %p520_p12 }
  0x21   :  { %p523_p1 = pnand %p522_p0, %p516_p11 }
  0x23   :  { %526 = shalt.err (!%p523_p1)
}
  0x24   :  { %s559_s0 = smov 128   ;;  %s560_s10 = smov 8  }
  0x25   :  { %34 = dma.hbm_to_vmem [thread:$0]  %s636_s1, 6144, %s29_s28, [#allocation6], %s559_s0, %s559_s0, %s560_s10  }
  0x26   :  { %549 = dma.done.wait [#allocation3], 384  }
  0x27   :  { %550 = vsyncadd [#allocation3], 4294966912 }
  0x28   :  { %551 = dma.done.wait [#allocation6], 6144  }
  0x29   :  { %552 = vsyncadd [#allocation6], 4294961152  ;;  %v561_v0 = vmov 0.0|0.0   ;;  %vm562_vm0 = vmmov 0   ;;  %v563_v1 = vmov 0.0   ;;  %v63_v2 = vld [vmem:[#allocation5 + $0x80] sm:$0xff]  ;;  %v113_v29 = vlaneseq }
  0x2a   :  { %436 = vmatprep.subr.bf16.mxu1 %v561_v0  ;;  %401 = vmatprep.mubr.msk.f32.mxu1 %vm562_vm0, %v563_v1  ;;  %v64_v3 = vld [vmem:[#allocation5 + $0x88] sm:$0xff]  ;;  %v47_v4 = vld [vmem:[#allocation5] sm:$0xff]  ;;  %v65_v7 = vld [vmem:[#allocation5 + $0x90] sm:$0xff]  ;;  %v564_v27 = vmov 1983009808  }
  0x2b   :  { %v404_v5 = vpack.c.bf16 %v64_v3, %v63_v2  ;;  %v48_v6 = vld [vmem:[#allocation5 + $0x8] sm:$0xff]  ;;  %v66_v8 = vld [vmem:[#allocation5 + $0x98] sm:$0xff]  ;;  %v49_v11 = vld [vmem:[#allocation5 + $0x10] sm:$0xff]  ;;  %v111_v28 = vunpack.c.l.s4 %v564_v27  ;;  %v114_v40 = vshrl.u32 %v113_v29, 7 }
  0x2c   :  { %v406_v9 = vpack.c.bf16 %v48_v6, %v47_v4  ;;  %v408_v10 = vpack.c.bf16 %v66_v8, %v65_v7  ;;  %v50_v12 = vld [vmem:[#allocation5 + $0x18] sm:$0xff]  ;;  %v79_v13 = vld [vmem:[#allocation5 + $0x100] sm:$0xff]  ;;  %v80_v14 = vld [vmem:[#allocation5 + $0x108] sm:$0xff] }
  0x2d   :  { %405 = vmatprep.subr.bf16.mxu0 %v404_v5  ;;  %v67_v15 = vld [vmem:[#allocation5 + $0xa0] sm:$0xff]  ;;  %v68_v16 = vld [vmem:[#allocation5 + $0xa8] sm:$0xff]  ;;  %v410_v17 = vpack.c.bf16 %v50_v12, %v49_v11  ;;  %v437_v18 = vpack.c.bf16 %v80_v14, %v79_v13  ;;  %v81_v19 = vld [vmem:[#allocation5 + $0x110] sm:$0xff]  ;;  %v112_v39 = vunpack.c.0.s8 %v111_v28 }
  0x2e   :  { %407 = vmatpush3.bf16.msra.mxu0 %v406_v9  ;;  %v412_v20 = vpack.c.bf16 %v68_v16, %v67_v15  ;;  %v51_v21 = vld [vmem:[#allocation5 + $0x20] sm:$0xff]  ;;  %v52_v22 = vld [vmem:[#allocation5 + $0x28] sm:$0xff]  ;;  %v82_v23 = vld [vmem:[#allocation5 + $0x118] sm:$0xff] }
  0x2f   :  { %409 = vmatprep.subr.bf16.mxu0 %v408_v10  ;;  %438 = vmatpush3.bf16.msra.mxu1 %v437_v18  ;;  %v440_v24 = vpack.c.bf16 %v82_v23, %v81_v19  ;;  %v69_v25 = vld [vmem:[#allocation5 + $0xb0] sm:$0xff]  ;;  %v70_v26 = vld [vmem:[#allocation5 + $0xb8] sm:$0xff]  ;;  %v83_v30 = vld [vmem:[#allocation5 + $0x120] sm:$0xff]  ;;  %v414_v32 = vpack.c.bf16 %v52_v22, %v51_v21  ;;  %v115_v51 = vsub.s32 %v112_v39, %v114_v40 }
  0x30   :  { %439 = vmatprep.subr.bf16.mxu1 %v561_v0  ;;  %v84_v31 = vld [vmem:[#allocation5 + $0x128] sm:$0xff]  ;;  %v416_v33 = vpack.c.bf16 %v70_v26, %v69_v25  ;;  %v53_v34 = vld [vmem:[#allocation5 + $0x30] sm:$0xff]  ;;  %v54_v35 = vld [vmem:[#allocation5 + $0x38] sm:$0xff] }
  0x31   :  { %v443_v36 = vpack.c.bf16 %v84_v31, %v83_v30  ;;  %v71_v37 = vld [vmem:[#allocation5 + $0xc0] sm:$0xff]  ;;  %v72_v38 = vld [vmem:[#allocation5 + $0xc8] sm:$0xff]  ;;  %v85_v41 = vld [vmem:[#allocation5 + $0x130] sm:$0xff]  ;;  %v418_v43 = vpack.c.bf16 %v54_v35, %v53_v34 }
  0x32   :  { %411 = vmatpush3.bf16.msra.mxu0 %v410_v17  ;;  %v86_v42 = vld [vmem:[#allocation5 + $0x138] sm:$0xff]  ;;  %v420_v44 = vpack.c.bf16 %v72_v38, %v71_v37  ;;  %v55_v45 = vld [vmem:[#allocation5 + $0x40] sm:$0xff]  ;;  %v56_v46 = vld [vmem:[#allocation5 + $0x48] sm:$0xff] }
  0x33   :  { %413 = vmatprep.subr.bf16.mxu0 %v412_v20  ;;  %441 = vmatpush3.bf16.msra.mxu1 %v440_v24  ;;  %v446_v47 = vpack.c.bf16 %v86_v42, %v85_v41  ;;  %v73_v48 = vld [vmem:[#allocation5 + $0xd0] sm:$0xff]  ;;  %v74_v49 = vld [vmem:[#allocation5 + $0xd8] sm:$0xff]  ;;  %v87_v50 = vld [vmem:[#allocation5 + $0x140] sm:$0xff]  ;;  %v422_v53 = vpack.c.bf16 %v56_v46, %v55_v45 }
  0x34   :  { %442 = vmatprep.subr.bf16.mxu1 %v561_v0  ;;  %v88_v52 = vld [vmem:[#allocation5 + $0x148] sm:$0xff]  ;;  %v424_v55 = vpack.c.bf16 %v74_v49, %v73_v48  ;;  %v57_v56 = vld [vmem:[#allocation5 + $0x50] sm:$0xff]  ;;  %v58_v57 = vld [vmem:[#allocation5 + $0x58] sm:$0xff] }
  0x35   :  { %v473_v54 = vld [vmem:[#allocation2] ss:$6 sps:$4 sm:$0xff]   ;;  %v476_v58 = vld [vmem:[#allocation2 + $0xc] ss:$6 sps:$4 sm:$0xff]   ;;  %v449_v59 = vpack.c.bf16 %v88_v52, %v87_v50  ;;  %v75_v60 = vld [vmem:[#allocation5 + $0xe0] sm:$0xff]  ;;  %v426_v3 = vpack.c.bf16 %v58_v57, %v57_v56 }
  0x36   :  { %415 = vmatpush3.bf16.msra.mxu0 %v414_v32  ;;  %v76_v61 = vld [vmem:[#allocation5 + $0xe8] sm:$0xff]  ;;  %v116_v62 = vrot.slane %v473_v54, %v115_v51  ;;  %v89_v63 = vld [vmem:[#allocation5 + $0x150] sm:$0xff]  ;;  %v90_v1 = vld [vmem:[#allocation5 + $0x158] sm:$0xff]  ;;  %v130_v2 = vrot.slane %v476_v58, %v115_v51 }
  0x37   :  { %417 = vmatprep.subr.bf16.mxu0 %v416_v33  ;;  %444 = vmatpush3.bf16.msra.mxu1 %v443_v36  ;;  %v428_v4 = vpack.c.bf16 %v76_v61, %v75_v60  ;;  %v59_v5 = vld [vmem:[#allocation5 + $0x60] sm:$0xff]  ;;  %v60_v6 = vld [vmem:[#allocation5 + $0x68] sm:$0xff]  ;;  %v452_v8 = vpack.c.bf16 %v90_v1, %v89_v63  ;;  %v77_v9 = vld [vmem:[#allocation5 + $0xf0] sm:$0xff] }
  0x38   :  { %445 = vmatprep.subr.bf16.mxu1 %v561_v0  ;;  %v139_v7 = vcombine.high %v116_v62, %v130_v2  ;;  %v78_v10 = vld [vmem:[#allocation5 + $0xf8] sm:$0xff]  ;;  %v91_v11 = vld [vmem:[#allocation5 + $0x160] sm:$0xff]  ;;  %v92_v12 = vld [vmem:[#allocation5 + $0x168] sm:$0xff]  ;;  %v430_v13 = vpack.c.bf16 %v60_v6, %v59_v5  ;;  %v138_v26 = vcombine.low %v116_v62, %v130_v2 }
  0x39   :  { %v61_v14 = vld [vmem:[#allocation5 + $0x70] sm:$0xff]  ;;  %v62_v15 = vld [vmem:[#allocation5 + $0x78] sm:$0xff]  ;;  %v432_v16 = vpack.c.bf16 %v78_v10, %v77_v9  ;;  %v455_v19 = vpack.c.bf16 %v92_v12, %v91_v11  ;;  %v316_v30 = vld [vmem:[%s637_s2] ss:$0 sm:$0xff] }
  0x3a   :  { %419 = vmatpush3.bf16.msra.mxu0 %v418_v43  ;;  %208 = vmatprep.mubr.f32.mxu0 %v139_v7  ;;  %v475_v17 = vld [vmem:[#allocation2 + $0x4] ss:$6 sps:$4 sm:$0x33]   ;;  %v478_v18 = vld [vmem:[#allocation2 + $0x10] ss:$6 sps:$4 sm:$0x33]   ;;  %v434_v22 = vpack.c.bf16 %v62_v15, %v61_v14 }
  0x3b   :  { %421 = vmatprep.subr.bf16.mxu0 %v420_v44  ;;  %447 = vmatpush3.bf16.msra.mxu1 %v446_v47  ;;  %v93_v20 = vld [vmem:[#allocation5 + $0x170] sm:$0xff]  ;;  %v94_v21 = vld [vmem:[#allocation5 + $0x178] sm:$0xff]  ;;  %v123_v23 = vrot.slane %v475_v17, %v115_v51  ;;  %v137_v24 = vrot.slane %v478_v18, %v115_v51 }
  0x3c   :  { %448 = vmatprep.subr.bf16.mxu1 %v561_v0  ;;  %v458_v25 = vpack.c.bf16 %v94_v21, %v93_v20 }
  0x3d   :  { %v140_v27 = vcombine.low %v123_v23, %v137_v24 }
  0x3e   :  { %423 = vmatpush3.bf16.msra.mxu0 %v422_v53 }
  0x3f   :  { %425 = vmatprep.subr.bf16.mxu0 %v424_v55  ;;  %450 = vmatpush3.bf16.msra.mxu1 %v449_v59 }
  0x40   :  { %451 = vmatprep.subr.bf16.mxu1 %v561_v0 }
  0x42   :  { %427 = vmatpush3.bf16.msra.mxu0 %v426_v3 }
  0x43   :  { %429 = vmatprep.subr.bf16.mxu0 %v428_v4  ;;  %453 = vmatpush3.bf16.msra.mxu1 %v452_v8 }
  0x44   :  { %454 = vmatprep.subr.bf16.mxu1 %v561_v0 }
  0x46   :  { %431 = vmatpush3.bf16.msra.mxu0 %v430_v13 }
  0x47   :  { %433 = vmatprep.subr.bf16.mxu0 %v432_v16  ;;  %456 = vmatpush3.bf16.msra.mxu1 %v455_v19 }
  0x48   :  { %457 = vmatprep.subr.bf16.mxu1 %v561_v0 }
  0x4a   :  { %435 = vmatpush3.bf16.msra.mxu0 %v434_v22 }
  0x4b   :  { %459 = vmatpush3.bf16.msra.mxu1 %v458_v25 }
  0x4d   :  { %209 = vmatmul.mubr.f32.vlgmr.msra.gmra.mrb[0].mxu0 %v138_v26 }
  0x4e   :  { %402 = vmatmul.mubr.f32.vlgmr.msra.gmra.mrb[0].mxu1 %v140_v27 }
 0x120   :  { %v349_v28 = vpop.f32.mrb[0].mxu0 }
 0x121   :  { %v350_v29 = vpop.f32.mrb[1].mxu0  ;;  %v280_v32 = vpop.f32.mrb[0].mxu1 }
 0x122   :  { %v351_v31 = vadd.f32 %v350_v29, %v349_v28  ;;  %v403_v33 = vpop.f32.mrb[1].mxu1 }
 0x124   :  { %v211_v34 = vadd.f32 %v351_v31, %v316_v30 }
 0x126   :  { %v281_v35 = vadd.f32 %v280_v32, %v211_v34 }
 0x128   :  { %v284_v36 = vmul.f32 %v281_v35, %v281_v35 }
 0x12a   :  { %285 = vadd.xlane.f32.xlu0 %v284_v36 }
 0x1b7   :  { %v286_v37 = vpop.xlane.xlu0 %285 }
 0x1b8   :  { %479 = vrsqrt.f32 %v286_v37  ;;  %vm289_vm1 = vcmp.eq.f32.partialorder %v286_v37, inf  ;;  %v292_v39 = vand.u32 2147483648, %v286_v37  ;;  %vm291_vm2 = vcmp.eq.f32.partialorder %v286_v37, 0.0 }
 0x1c2   :  { %v480_v0 = vpop.eup %479 }
 0x1c3   :  { %v288_v38 = vmul.f32 %v480_v0, %v286_v37 }
 0x1c5   :  { %v290_v40 = vsel %vm289_vm1, %v286_v37, %v288_v38 }
 0x1c6   :  { %v293_v41 = vsel %vm291_vm2, %v292_v39, %v290_v40 }
 0x1c7   :  { %v294_v42 = vadd.f32 1e-08, %v293_v41 }
 0x1c9   :  { %481 = vrcp.f32 %v294_v42 }
 0x1d3   :  { %v482_v43 = vpop.eup %481 }
 0x1d4   :  { %v296_v44 = vmul.f32 %v482_v43, %v281_v35 }
 0x1d6   :  { %297 = vst [vmem:[#allocation7] sm:$0xff] %v296_v44 }
 0x1d7   :  { %302 = vsyncadd [#allocation4], 96  ;;  %s565_s2 = smov [#allocation7]  }
 0x1d8   :  { %s303_s14 = sshll.u32 %s565_s2, 4  ;;  %s304_s14 = int_to_ptr.vmem [resolvable:$true] %s303_s14 }
 0x1d9   :  { %s527_s15 = scalar_lea.vmem %s304_s14, 32  ;;  %s531_s16 = scalar_lea.vmem %s304_s14, 128 }
 0x1da   :  { %p528_p2 = scmp.ne.s32.totalorder %s304_s14, %s527_s15  ;;  %p532_p3 = scmp.lt.s32.totalorder %s304_s14, %s304_s14 }
 0x1db   :  { %p533_p4 = scmp.lt.s32.totalorder %s531_s16, %s527_s15 }
 0x1dd   :  { %p534_p5 = por %p533_p4, %p532_p3 }
 0x1df   :  { %p535_p6 = pnand %p534_p5, %p528_p2 }
 0x1e1   :  { %538 = shalt.err (!%p535_p6)
}
 0x1e2   :  { %s539_s19 = scalar_lea.hbm %s638_s3, 32 }
 0x1e3   :  { %p540_p7 = scmp.ne.s32.totalorder %s638_s3, %s539_s19  ;;  %p543_p8 = scmp.lt.u32.totalorder %s539_s19, %s638_s3 }
 0x1e5   :  { %p545_p9 = pnand %p543_p8, %p540_p7 }
 0x1e7   :  { %548 = shalt.err (!%p545_p9)
}
 0x1e8   :  { %s566_s24 = smov 32   ;;  %s567_s25 = smov 2  }
 0x1e9   :  { %309 = dma.vmem_to_hbm [thread:$0]  %s304_s14, 32, %s638_s3, [#allocation4], %s566_s24, %s566_s24, %s567_s25  }
 0x1ea   :  { %553 = dma.done.wait [#allocation4], 128  }
 0x1eb   :  { %554 = vsyncadd [#allocation4], 4294967168 }
 0x1ec   :  { %313 = vsyncpa [#allocation3], 1 }
 0x1ed   :  { %314 = vsyncpa [#allocation6], 1 }
 0x1ee   :  { %315 = vsyncpa [#allocation4], 1 }

</bundles_post_ra>
